<compile_context>
chip_gen: v5e
topology: v5e:2x2
jax: 0.10.0
libtpu: 0.0.40
codegen_flags: <defaults>
</compile_context>

<pallas_src>
import jax
import jax.numpy as jnp
from jax.experimental import pallas as pl
from jax.experimental.pallas import tpu as pltpu


def _cdiv(a, b):
    return -(-a // b)


def _round_up(x, m):
    return _cdiv(x, m) * m


def _choose_tn(intermediate_size):
    # Lane-dense output tile: multiple of 128, capped at 512.
    return min(512, _round_up(intermediate_size, 128))


def _choose_tk(hidden_size):
    if hidden_size <= 2048 or hidden_size % 128 != 0:
        # Single K step.
        # TODO(synk): pad K for very large hidden sizes that are not multiples
        # of 128 so they can still be K-tiled.
        return hidden_size
    for cand in (2048, 1792, 1536, 1280, 1024, 768, 512, 384, 256, 128):
        if hidden_size % cand == 0:
            return cand
    return hidden_size


def _vmem_capacity_bytes():
    try:
        cap = getattr(pltpu.get_tpu_info(), "vmem_capacity_bytes", None)
        if cap:
            return int(cap)
    except Exception:
        pass
    return 64 * 1024 * 1024  # conservative fallback (v7x per-TC capacity)


def _footprint_bytes(tm, tk, tn, x_b, w_b, o_b):
    # Double-buffered x / w / bias / out blocks + single f32 accumulator scratch.
    return (2 * (tm * tk * x_b + tk * tn * w_b + tn * 4)
            + 2 * tm * tn * o_b + tm * tn * 4)


def _pick_tm(M, tk, tn, x_b, w_b, o_b, budget):
    # Prefer >= 2 blocks along M (keeps both v7x TensorCores busy) before
    # growing tm; then pick the largest tile whose footprint fits the budget.
    m_cap = _round_up(max(_cdiv(M, 2), 1), 8) if M > 8 else _round_up(M, 8)
    cands = sorted({min(c, m_cap) for c in (1024, 512, 384, 256, 128, 64, 32, 16, 8)},
                   reverse=True)
    for tm in cands:
        if _footprint_bytes(tm, tk, tn, x_b, w_b, o_b) <= budget:
            return tm
    return cands[-1]


def _intermediate_kernel(x_ref, w_ref, b_ref, o_ref, acc_ref):
    # x_ref: (tm, tk) activations (input dtype, cast to bf16 on the VPU)
    # w_ref: (tk, tn) pre-transposed bf16 weight tile (K on sublanes, N on lanes)
    # b_ref: (1, tn)  f32 bias tile
    # o_ref: (tm, tn) output tile
    # acc_ref: (tm, tn) f32 accumulator scratch (persists across the K axis)
    k = pl.program_id(2)

    @pl.when(k == 0)
    def _():
        acc_ref[...] = jnp.zeros_like(acc_ref)

    acc_ref[...] += jnp.dot(
        x_ref[...].astype(w_ref.dtype), w_ref[...],
        preferred_element_type=jnp.float32)

    @pl.when(k == pl.num_programs(2) - 1)
    def _():
        o_ref[...] = jnp.maximum(acc_ref[...] + b_ref[...], 0.0).astype(o_ref.dtype)


def prepare_params(weight, bias, compute_dtype=jnp.bfloat16):
    """One-time parameter prep (analogue of nn.Linear param registration).

    * Pads the intermediate (output) dim to a lane-dense multiple of the output
      tile (padded rows are zero -> relu(0) columns, sliced off after the call).
    * Pre-transposes the weight to (H, I_pad) so the kernel runs the canonical
      x @ w contraction (no per-tile XLU transpose) and casts it to bf16 for
      the bf16-native MXU (accumulation stays f32 in the kernel).
    """
    I, H = weight.shape
    tn = _choose_tn(I)
    I_pad = _round_up(I, tn)
    if I_pad != I:
        weight = jnp.pad(weight, ((0, I_pad - I), (0, 0)))
        bias = jnp.pad(bias, (0, I_pad - I))
    weight_t = jnp.transpose(weight).astype(compute_dtype)        # (H, I_pad)
    return weight_t, bias.reshape(1, I_pad).astype(jnp.float32)   # (1, I_pad)


def intermediate_forward(hidden_states, weight_t, bias_p, intermediate_size):
    """hidden_states: (..., H) float32
       weight_t:      (H, I_pad) bf16   from prepare_params
       bias_p:        (1, I_pad) f32    from prepare_params
       returns        (..., intermediate_size) = relu(hidden_states @ W.T + b)
    """
    *lead, H = hidden_states.shape
    assert weight_t.shape[0] == H, "hidden size mismatch"
    I_pad = weight_t.shape[1]

    M = 1
    for d in lead:
        M *= d
    x2d = hidden_states.reshape(M, H)

    x_bytes = jnp.dtype(hidden_states.dtype).itemsize
    w_bytes = jnp.dtype(weight_t.dtype).itemsize
    o_bytes = x_bytes

    tn = min(512, I_pad)
    assert I_pad % tn == 0
    tk = _choose_tk(H)
    n_k = H // tk
    n_j = I_pad // tn

    cap = _vmem_capacity_bytes()
    budget = (3 * cap) // 4

    tm = _pick_tm(M, tk, tn, x_bytes, w_bytes, o_bytes, budget)
    # Re-balance tm so M padding stays small (same number of M blocks).
    n_i0 = _cdiv(M, tm)
    tm = min(tm, _round_up(_cdiv(M, n_i0), 8))
    M_pad = _round_up(M, tm)
    n_i = M_pad // tm

    if M_pad != M:
        x2d = jnp.pad(x2d, ((0, M_pad - M), (0, 0)))

    # Grid ordering: with a single K step, consecutive-index dedup makes the
    # non-varying operand stream once.  Put j outermost when the weight stream
    # would otherwise dominate HBM traffic.
    w_total = I_pad * H * w_bytes
    x_total = M_pad * H * x_bytes
    swap = (n_k == 1) and (w_total * (n_i - 1) > x_total * (n_j - 1))

    if swap:
        grid = (n_j, n_i, n_k)
        x_map = lambda j, i, k: (i, k)
        w_map = lambda j, i, k: (k, j)
        b_map = lambda j, i, k: (0, j)
        o_map = lambda j, i, k: (i, j)
    else:
        grid = (n_i, n_j, n_k)
        x_map = lambda i, j, k: (i, k)
        w_map = lambda i, j, k: (k, j)
        b_map = lambda i, j, k: (0, j)
        o_map = lambda i, j, k: (i, j)

    footprint = _footprint_bytes(tm, tk, tn, x_bytes, w_bytes, o_bytes)
    vmem_limit = min(max(footprint + footprint // 4 + (4 << 20), 16 << 20), cap)

    out2d = pl.pallas_call(
        _intermediate_kernel,
        out_shape=jax.ShapeDtypeStruct((M_pad, I_pad), hidden_states.dtype),
        grid_spec=pltpu.PrefetchScalarGridSpec(
            num_scalar_prefetch=0,
            grid=grid,
            in_specs=[
                pl.BlockSpec((tm, tk), x_map),   # activation tile
                pl.BlockSpec((tk, tn), w_map),   # pre-transposed weight tile
                pl.BlockSpec((1, tn), b_map),    # bias tile (re-fetched only on j change)
            ],
            out_specs=pl.BlockSpec((tm, tn), o_map),
            scratch_shapes=[pltpu.VMEM((tm, tn), jnp.float32)],
        ),
        compiler_params=pltpu.CompilerParams(
            dimension_semantics=("parallel", "parallel", "arbitrary"),
            vmem_limit_bytes=vmem_limit,
        ),
    )(x2d, weight_t, bias_p)

    out2d = out2d[:M, :intermediate_size]
    return out2d.reshape(*lead, intermediate_size)


if __name__ == "__main__":
    # Deterministic synthetic params / inputs (no checkpoint loading).
    key = jax.random.PRNGKey(0)
    k_x, k_w, k_b = jax.random.split(key, 3)

    batch, seq, hidden_size, intermediate_size = 2, 8, 32, 64

    hidden_states = jax.random.normal(
        k_x, (batch, seq, hidden_size), dtype=jnp.float32)
    # nn.Linear(hidden_size, intermediate_size): weight (I, H), bias (I,)
    bound = 1.0 / (hidden_size ** 0.5)
    weight = jax.random.uniform(k_w, (intermediate_size, hidden_size),
                                minval=-bound, maxval=bound, dtype=jnp.float32)
    bias = jax.random.uniform(k_b, (intermediate_size,),
                              minval=-bound, maxval=bound, dtype=jnp.float32)

    # One-time parameter prep: lane-dense padding + pre-transpose + bf16 cast.
    weight_t, bias_p = prepare_params(weight, bias)

    fwd = jax.jit(intermediate_forward, static_argnums=(3,))
    out = jax.block_until_ready(fwd(hidden_states, weight_t, bias_p, intermediate_size))
    assert out.shape == (batch, seq, intermediate_size)

    # Reference mirroring the kernel's bf16-input / f32-accumulate matmul.
    ref_bf16 = jax.nn.relu(
        jnp.einsum("bsh,hi->bsi",
                   hidden_states.astype(jnp.bfloat16),
                   weight.T.astype(jnp.bfloat16),
                   preferred_element_type=jnp.float32) + bias)
    assert jnp.allclose(out, ref_bf16, atol=2e-3, rtol=2e-3), "mismatch vs bf16 reference"

    # Module-semantics reference (pure f32); loose tolerance for bf16 MXU inputs.
    ref_f32 = jax.nn.relu(jnp.einsum("bsh,ih->bsi", hidden_states, weight) + bias)
    assert jnp.allclose(out, ref_f32, atol=5e-2, rtol=5e-2), "mismatch vs f32 reference"

    print("KERNEL_OK")
</pallas_src>

<mosaic_0001>
module attributes {stable_mosaic.version = 11 : i64} {
  func.func @_intermediate_kernel(%arg0: i32, %arg1: i32, %arg2: i32, %arg3: memref<8x32xf32, #tpu.memory_space<vmem>>, %arg4: memref<32x128xbf16, #tpu.memory_space<vmem>>, %arg5: memref<1x128xf32, #tpu.memory_space<vmem>>, %arg6: memref<8x128xf32, #tpu.memory_space<vmem>>, %arg7: memref<8x128xf32, #tpu.memory_space<vmem>>) attributes {dimension_semantics = [#tpu.dimension_semantics<parallel>, #tpu.dimension_semantics<parallel>, #tpu.dimension_semantics<arbitrary>], iteration_bounds = array<i64: 1, 2, 1>, scalar_prefetch = 0 : i64, scratch_operands = 1 : i64, tpu.core_type = #tpu.core_type<tc>, window_params = [{transform_indices = @transform_0, window_bounds = array<i64: 8, 32>}, {transform_indices = @transform_1, window_bounds = array<i64: 32, 128>}, {transform_indices = @transform_2, window_bounds = array<i64: 1, 128>}, {transform_indices = @transform_3, window_bounds = array<i64: 8, 128>}]} {
    %c0_i32 = arith.constant 0 : i32
    %0 = arith.cmpi eq, %arg2, %c0_i32 : i32
    %1 = arith.extui %0 : i1 to i32
    %c0_i32_0 = arith.constant 0 : i32
    %2 = arith.cmpi ne, %1, %c0_i32_0 : i32
    scf.if %2 {
      %cst_10 = arith.constant 0.000000e+00 : f32
      %13 = vector.broadcast %cst_10 : f32 to vector<8x128xf32>
      %c0_11 = arith.constant 0 : index
      %c0_12 = arith.constant 0 : index
      %14 = vector.load %arg7[%c0_11, %c0_12] : memref<8x128xf32, #tpu.memory_space<vmem>>, vector<8x128xf32>
      tpu.vector_store %arg7[%c0_11, %c0_12], %13 {strides = array<i32>} : memref<8x128xf32, #tpu.memory_space<vmem>>, vector<8x128xf32>,
    } else {
    }
    %c0 = arith.constant 0 : index
    %c0_1 = arith.constant 0 : index
    %3 = vector.load %arg7[%c0, %c0_1] : memref<8x128xf32, #tpu.memory_space<vmem>>, vector<8x128xf32>
    %c0_2 = arith.constant 0 : index
    %c0_3 = arith.constant 0 : index
    %4 = vector.load %arg3[%c0_2, %c0_3] : memref<8x32xf32, #tpu.memory_space<vmem>>, vector<8x32xf32>
    %5 = arith.truncf %4 : vector<8x32xf32> to vector<8x32xbf16>
    %c0_4 = arith.constant 0 : index
    %c0_5 = arith.constant 0 : index
    %6 = vector.load %arg4[%c0_4, %c0_5] : memref<32x128xbf16, #tpu.memory_space<vmem>>, vector<32x128xbf16>
    %cst = arith.constant dense<0.000000e+00> : vector<8x128xf32>
    %7 = tpu.matmul %5, %6, %cst {dimension_numbers = #tpu.dot_dimension_numbers<[1], [0], [0], [1], [0, 0, 1, 1], [], []>} : vector<8x32xbf16>, vector<32x128xbf16>, vector<8x128xf32> -> vector<8x128xf32>
    %8 = arith.addf %3, %7 : vector<8x128xf32>
    %c0_6 = arith.constant 0 : index
    %c0_7 = arith.constant 0 : index
    %9 = vector.load %arg7[%c0_6, %c0_7] : memref<8x128xf32, #tpu.memory_space<vmem>>, vector<8x128xf32>
    tpu.vector_store %arg7[%c0_6, %c0_7], %8 {strides = array<i32>} : memref<8x128xf32, #tpu.memory_space<vmem>>, vector<8x128xf32>,
    %c0_i32_8 = arith.constant 0 : i32
    %10 = arith.cmpi eq, %arg2, %c0_i32_8 : i32
    %11 = arith.extui %10 : i1 to i32
    %c0_i32_9 = arith.constant 0 : i32
    %12 = arith.cmpi ne, %11, %c0_i32_9 : i32
    scf.if %12 {
      %c0_10 = arith.constant 0 : index
      %c0_11 = arith.constant 0 : index
      %13 = vector.load %arg7[%c0_10, %c0_11] : memref<8x128xf32, #tpu.memory_space<vmem>>, vector<8x128xf32>
      %c0_12 = arith.constant 0 : index
      %c0_13 = arith.constant 0 : index
      %14 = vector.load %arg5[%c0_12, %c0_13] : memref<1x128xf32, #tpu.memory_space<vmem>>, vector<1x128xf32>
      %15 = vector.broadcast %14 : vector<1x128xf32> to vector<8x128xf32>
      %16 = arith.addf %13, %15 : vector<8x128xf32>
      %cst_14 = arith.constant 0.000000e+00 : f32
      %17 = vector.broadcast %cst_14 : f32 to vector<8x128xf32>
      %18 = arith.maximumf %16, %17 : vector<8x128xf32>
      %c0_15 = arith.constant 0 : index
      %c0_16 = arith.constant 0 : index
      %19 = vector.load %arg6[%c0_15, %c0_16] : memref<8x128xf32, #tpu.memory_space<vmem>>, vector<8x128xf32>
      tpu.vector_store %arg6[%c0_15, %c0_16], %18 {strides = array<i32>} : memref<8x128xf32, #tpu.memory_space<vmem>>, vector<8x128xf32>,
    } else {
    }
    return
  }
  func.func @transform_0(%arg0: i32, %arg1: i32, %arg2: i32) -> (i32, i32) {
    %c0_i32 = arith.constant 0 : i32
    return %arg1, %arg2 : i32, i32
  }
  func.func @transform_1(%arg0: i32, %arg1: i32, %arg2: i32) -> (i32, i32) {
    %c0_i32 = arith.constant 0 : i32
    return %arg2, %arg0 : i32, i32
  }
  func.func @transform_2(%arg0: i32, %arg1: i32, %arg2: i32) -> (i32, i32) {
    %c0_i32 = arith.constant 0 : i32
    %c0_i32_0 = arith.constant 0 : i32
    return %c0_i32, %arg0 : i32, i32
  }
  func.func @transform_3(%arg0: i32, %arg1: i32, %arg2: i32) -> (i32, i32) {
    %c0_i32 = arith.constant 0 : i32
    return %arg1, %arg0 : i32, i32
  }
}

</mosaic_0001>

<bundles_post_ra>
// kernel: intermediate_forward.1
= control target key start
LH: loop header
LB: loop body
LE: loop exit
PB: predicated region body
PF: predicated region fallthrough
CT: control target
= control target key end

     0   :  { %8 = vsyncpa [#allocation4], 0  ;;  %s779_s0 = inlined_call_operand.hbm [shape: f32[16,32], index: 0, kind: input, shape index: {}]   ;;  %s780_s1 = inlined_call_operand.hbm [shape: bf16[32,128], index: 1, kind: input, shape index: {}]   ;;  %s781_s2 = inlined_call_operand.vmem [shape: f32[1,128], index: 2, kind: input, shape index: {}]   ;;  %s782_s3 = inlined_call_operand.vmem [shape: f32[16,128], index: 3, kind: output, shape index: {}]  }
   0x1   :  { %10 = vsyncpa [#allocation4 + $0x1], 0 }
   0x2   :  { %11 = vsyncpa [#allocation6], 0  ;;  %s662_s12 = smov 0   ;;  %s664_s13 = smov 0  }
   0x3   :  { %s666_s14 = smov 0   ;;  %s668_s15 = smov 0  }
   0x4   :  { %s670_s16 = smov 0   ;;  %s672_s17 = smov 0  }
   0x5 LB: > { %s429_s18 = sadd.s32 4294967295, %s637_s17   ;;  %p431_p0 = scmp.ge.s32.totalorder %s637_s17, 1  ;;  %s637_s17 = sphi %s672_s17, %s17_s17   ;;  %s633_s16 = sphi %s670_s16, %s791_s16   ;;  %s629_s15 = sphi %s668_s15, %s790_s15   ;;  %s625_s14 = sphi %s666_s14, %s789_s14   ;;  %s621_s13 = sphi %s664_s13, %s788_s13   ;;  %s617_s12 = sphi %s662_s12, %s787_s12  }
   0x6   : > { %p694_p1 = scmp.eq.s32.totalorder %s429_s18, 0  ;;  %p151_p2 = scmp.lt.s32.totalorder %s637_s17, 3 }
   0x7   : > { %s166_s22 = sshll.u32 %s780_s1, 4  ;;  %s639_s24 = smov [#allocation5]   ;;  %s167_s22 = int_to_ptr.hbm [resolvable:$true] %s166_s22 }
   0x8   : > { %p702_p3 = pnand %p431_p0, %p151_p2  ;;  %s168_s25 = sshll.u32 %s639_s24, 4  ;;  %s169_s25 = int_to_ptr.vmem [resolvable:$true] %s168_s25 }
   0x9   : > { %s640_s26 = smov 64   ;;  %s641_s27 = smov 4  }
   0xa   : > { %p460_p4 = pneg %p702_p3  ;;  %s32_s28 = sadd.s32 1, %s633_s16 }
   0xb   : > { %p34_p6 = scmp.ge.s32.totalorder %s32_s28, 2  ;;  %p52_p7 = scmp.ne.s32.totalorder %s625_s14, %s621_s13 }
   0xc   : > { %p461_p5 = pnand %p460_p4, %p694_p1  ;;  %p53_p8 = scmp.eq.s32.totalorder %s637_s17, 0 }
   0xd   : > { %s793_s28 = smov (%p34_p6, %s32_s28), 0  ;;  %s45_s29 = sadd.s32 1, %s625_s14 }
   0xe   : > { %463 = dma.hbm_to_vmem [thread:$0]  (!%p461_p5), %s167_s22, 256, %s169_s25, [#allocation6], %s640_s26, %s640_s26, %s641_s27  }
   0xf   : > { %p58_p9 = scmp.ne.s32.totalorder %s621_s13, %s617_s12  ;;  %s40_s30 = ssub.s32 %s633_s16, %s793_s28 }
  0x10   : > { %p721_p10 = por %p53_p8, %p52_p7  ;;  %p43_p11 = scmp.eq.s32.totalorder %s40_s30, 0 }
  0x11   : > { %p727_p12 = por %p694_p1, %p58_p9  ;;  %s188_s6 = sand.u32 1, %s625_s14  }
  0x12   : > { %s436_s7 = sshll.u32 %s633_s16, 3  ;;  %p469_p13 = scmp.lt.s32.totalorder %s637_s17, 2 }
  0x13   : > { %s734_s8 = scalar_select %p43_p11, %s625_s14, %s45_s29  }
  0x14   : > { %s435_s9 = sshll.u32 %s188_s6, 3  ;;  %s197_s12 = scalar_lea.hbm %s779_s0, %s436_s7 }
  0x15   : > { %s199_s18 = sshll.u32 %s197_s12, 4  ;;  %s192_s20 = scalar_lea.vmem [#allocation3], %s435_s9  ;;  %s200_s18 = int_to_ptr.hbm [resolvable:$true] %s199_s18 }
  0x16   : > { %s201_s21 = sshll.u32 %s192_s20, 4  ;;  %p465_p0 = pnand %p469_p13, %p721_p10  ;;  %s202_s21 = int_to_ptr.vmem [resolvable:$true] %s201_s21 }
  0x17   : > { %s189_s22 = scalar_lea.sflag [#allocation4], %s188_s6  ;;  %210 = sbr.rel (%p702_p3) target bundleno = 173 (0xad), region = 32 }
  0x18   : > { %467 = dma.hbm_to_vmem [thread:$0]  (!%p465_p0), %s200_s18, 128, %s202_s21, %s189_s22  }
  0x19   : > { %s212_s24 = sand.u32 (!%p702_p3), 1, %s621_s13  }
  0x1a   : > { %s438_s25 = sshll.u32 (!%p702_p3), %s212_s24, 3  ;;  %s213_s26 = scalar_lea.sflag (!%p702_p3), [#allocation4], %s212_s24 }
  0x1b   : > { %s216_s27 = scalar_lea.vmem (!%p702_p3), [#allocation3], %s438_s25 }
  0x1c   : > { %608 = dma.done.wait (%p727_p12), %s213_s26, 128  }
  0x1d   : > { %610 = vsyncadd (%p727_p12), %s213_s26, 4294967168 }
  0x1e   : > { %612 = dma.done.wait (%p694_p1), [#allocation6], 256  }
  0x1f   : > { %614 = vsyncadd (%p694_p1), [#allocation6], 4294967040  ;;  %v453_v0 = vld [vmem:[#allocation5 + $0x8] sm:$0xff]  ;;  %v452_v1 = vld [vmem:[#allocation5] sm:$0xff]  ;;  %vm286_vm0 = vcmask 261120   ;;  %p254_p2 = scmp.lt.s32.totalorder %s629_s15, 1 }
  0x20   : > { %296 = vmatpush.bf16.msra.mxu0 %v453_v0  ;;  %v268_v2 = vld [vmem:[%s216_s27] sm:$0xff] }
  0x21   : > { %v269_v3 = vpack.c.bf16 %v268_v2, %v268_v2  ;;  %s795_s15 = smov (!%p254_p2, %s629_s15), 1  ;;  %v522_v4 = vld [vmem:[%s781_s2] ss:$0 sm:$0xff] }
  0x22   : > { %s440_s30 = sshll.u32 %s795_s15, 3 }
  0x23   : > { %s260_s5 = scalar_lea.vmem %s782_s3, %s440_s30 }
  0x24   : > { %297 = vmatpush.bf16.msra.mxu0 %v452_v1 }
  0x27   : > { %449 = vmatmul.msk.bf16.vlgmr.msra.gmra.mxu0 %vm286_vm0, %v269_v3 }
  0xa4   : > { %v299_v5 = vpop.f32.mrf.mxu0 }
  0xa5   : > { %v313_v6 = vadd.f32 %v522_v4, %v299_v5 }
  0xa7   : > { %v314_v7 = vmax.f32 %v313_v6, 0.0 }
  0xa9   : > { %315 = vst [vmem:[%s260_s5] sm:$0xff] %v314_v7 }
  0xac   : > { %v301_v8 = vpop.f32.mrf.mxu0 }
  0xad PF: > { %s17_s17 = sadd.s32 1, %s637_s17   ;;  %s787_s12 = smov %s621_s13 }
  0xae   : > { %p14_p1 = scmp.ge.s32.totalorder %s17_s17, 4   ;;  %s788_s13 = smov %s625_s14 }
  0xaf   : > { %s789_s14 = smov %s734_s8  ;;  %s790_s15 = smov %s633_s16 }
  0xb0   : > { %s791_s16 = smov %s793_s28  ;;  %16 = sbr.rel (!%p14_p1) target bundleno = 5 (0x5), region = 88 }
  0xb5   :  { %341 = vsyncpa [#allocation4], 1 }
  0xb6   :  { %343 = vsyncpa [#allocation4 + $0x1], 1 }
  0xb7   :  { %344 = vsyncpa [#allocation6], 1 }

</bundles_post_ra>
